<compile_context>
chip_gen: v6e
topology: v6e:2x2x1
jax: 0.10.0
libtpu: 0.0.40
codegen_flags: <defaults>
</compile_context>

<pallas_src>
import numpy as np
import jax
import jax.numpy as jnp
from jax.experimental import pallas as pl
from jax.experimental.pallas import tpu as pltpu

# ----------------------------------------------------------------------------
# Config flag equivalent to `c.noise` in the original code.
NOISE_ENABLED = True

# ----------------------------------------------------------------------------
# Deterministic "parameters"
# ----------------------------------------------------------------------------
# GaussianBlur2D: fixed 3x3 Gaussian kernel, sigma = 1.0 (frozen, no grad).
_KSIZE = 3
_SIGMA_BLUR = 1.0
_g1 = np.exp(-0.5 * ((np.arange(_KSIZE) - _KSIZE // 2) ** 2) / _SIGMA_BLUR**2)
_g2 = np.outer(_g1, _g1)
GAUSS_W = (_g2 / _g2.sum()).astype(np.float32)          # (3, 3), baked as floats

# GaussianNoise: additive N(0, sigma^2) noise.
_SIGMA_NOISE = 0.1

# JPEGSimulator: 8x8 DCT matrix + standard luminance quantization table (Q=50).
def _dct_matrix(n=8):
    d = np.zeros((n, n), np.float64)
    for i in range(n):
        c = np.sqrt(1.0 / n) if i == 0 else np.sqrt(2.0 / n)
        for j in range(n):
            d[i, j] = c * np.cos((2 * j + 1) * i * np.pi / (2 * n))
    return d.astype(np.float32)

_DCT = _dct_matrix(8)
_QTABLE = np.array(
    [[16, 11, 10, 16, 24, 40, 51, 61],
     [12, 12, 14, 19, 26, 58, 60, 55],
     [14, 13, 16, 24, 40, 57, 69, 56],
     [14, 17, 22, 29, 51, 87, 80, 62],
     [18, 22, 37, 56, 68, 109, 103, 77],
     [24, 35, 55, 64, 81, 104, 113, 92],
     [49, 64, 78, 87, 103, 121, 120, 101],
     [72, 92, 95, 98, 112, 100, 103, 99]], dtype=np.float32)


# ----------------------------------------------------------------------------
# Kernel 1: GaussianBlur2D — 3x3 depthwise stencil, zero padding ("same").
# ----------------------------------------------------------------------------
def _blur_kernel(xp_ref, o_ref):
    # xp_ref: (TB, H+2, W+2) padded planes; o_ref: (TB, H, W)
    H = o_ref.shape[1]
    W = o_ref.shape[2]
    x = xp_ref[...].astype(jnp.float32)
    acc = jnp.zeros(o_ref.shape, jnp.float32)
    for di in range(_KSIZE):
        for dj in range(_KSIZE):
            w = float(GAUSS_W[di, dj])
            acc = acc + w * x[:, di:di + H, dj:dj + W]
    o_ref[...] = acc.astype(o_ref.dtype)


def _pick_batch_tile(nc, bytes_per_plane, budget=2 << 20):
    """Largest divisor of nc whose tile stays under ~2 MiB."""
    tb = 1
    for d in range(1, nc + 1):
        if nc % d == 0 and d * bytes_per_plane <= budget:
            tb = d
    return tb


def gaussian_blur(x):
    N, C, H, W = x.shape
    nc = N * C
    # TODO(synk): jnp.pad costs one extra HBM pass; in-kernel halo handling
    # (roll + edge masks) would remove it.
    xp = jnp.pad(x, ((0, 0), (0, 0), (1, 1), (1, 1))).reshape(nc, H + 2, W + 2)
    tb = _pick_batch_tile(nc, (H + 2) * (W + 2) * 4)
    out = pl.pallas_call(
        _blur_kernel,
        out_shape=jax.ShapeDtypeStruct((nc, H, W), x.dtype),
        grid=(nc // tb,),
        in_specs=[pl.BlockSpec((tb, H + 2, W + 2), lambda i: (i, 0, 0))],
        out_specs=pl.BlockSpec((tb, H, W), lambda i: (i, 0, 0)),
        compiler_params=pltpu.CompilerParams(dimension_semantics=("parallel",)),
    )(xp)
    return out.reshape(N, C, H, W)


# ----------------------------------------------------------------------------
# Kernel 2: GaussianNoise — x + sigma * N(0, 1).
# Portable counter-based hash PRNG (u32 VPU ops) + Box-Muller producing a
# pair of normals per transcendental set (halves EUP load vs. one-normal BM).
# ----------------------------------------------------------------------------
def _hash_u32(v):
    # "lowbias32" integer avalanche hash, all 32-bit ops (wrap-around mul).
    v = v ^ (v >> 16)
    v = v * jnp.uint32(0x7FEB352D)
    v = v ^ (v >> 15)
    v = v * jnp.uint32(0x846CA68B)
    v = v ^ (v >> 16)
    return v


def _box_muller_pair(p_i32, seed_u32):
    """p_i32: int32 array of unique pair indices -> two iid N(0,1) arrays."""
    c = p_i32.astype(jnp.uint32) * jnp.uint32(2) + seed_u32 * jnp.uint32(0x9E3779B9)
    h1 = _hash_u32(c)
    h2 = _hash_u32(c + jnp.uint32(1))
    m = jnp.uint32(0x7FFFFF)                                   # 23 random bits
    inv = jnp.float32(1.0 / (1 << 23))
    u1 = ((h1 & m).astype(jnp.int32).astype(jnp.float32) + 0.5) * inv  # (0,1)
    u2 = ((h2 & m).astype(jnp.int32).astype(jnp.float32) + 0.5) * inv
    r = jnp.sqrt(-2.0 * jnp.log(u1))
    theta = jnp.float32(2.0 * np.pi) * u2
    return r * jnp.cos(theta), r * jnp.sin(theta)


def _noise_kernel(seed_ref, x_ref, o_ref):
    tr, lane = x_ref.shape
    tile = pl.program_id(0)                       # folded into the counter so
    s = seed_ref[0].astype(jnp.uint32)            # every tile has its own stream
    if lane % 2 == 0:
        half = lane // 2
        row = jax.lax.broadcasted_iota(jnp.int32, (tr, half), 0)
        col = jax.lax.broadcasted_iota(jnp.int32, (tr, half), 1)
        p = tile * (tr * half) + row * half + col
        z1, z2 = _box_muller_pair(p, s)
        z = jnp.concatenate([z1, z2], axis=-1)
    else:  # odd fallback path: one normal per element
        row = jax.lax.broadcasted_iota(jnp.int32, (tr, lane), 0)
        col = jax.lax.broadcasted_iota(jnp.int32, (tr, lane), 1)
        p = tile * (tr * lane) + row * lane + col
        z, _ = _box_muller_pair(p, s)
    o_ref[...] = (x_ref[...].astype(jnp.float32)
                  + jnp.float32(_SIGMA_NOISE) * z).astype(o_ref.dtype)


def _flatten_lane_dense(x):
    total = x.size
    for lane in (512, 256, 128):
        if total % lane == 0:
            return x.reshape(total // lane, lane), lane
    w = x.shape[-1]
    return x.reshape(total // w, w), w


def _pick_tile_rows(rows, lane):
    budget_rows = max(8, (1 << 20) // (lane * 4))   # ~1 MiB per buffer
    if rows <= budget_rows:
        return rows
    for tr in range(budget_rows, 7, -1):
        if rows % tr == 0 and tr % 8 == 0:
            return tr
    return rows  # TODO(synk): pathological sizes fall back to one block


def gaussian_noise(x, seed):
    shape = x.shape
    x2d, lane = _flatten_lane_dense(x)              # lane-dense layout (>=128)
    rows = x2d.shape[0]
    tr = _pick_tile_rows(rows, lane)
    seed_arr = jnp.asarray(seed, dtype=jnp.int32).reshape((1,))
    out = pl.pallas_call(
        _noise_kernel,
        out_shape=jax.ShapeDtypeStruct(x2d.shape, x.dtype),
        grid=(rows // tr,),
        in_specs=[pl.BlockSpec(memory_space=pltpu.MemorySpace.SMEM),
                  pl.BlockSpec((tr, lane), lambda i: (i, 0))],
        out_specs=pl.BlockSpec((tr, lane), lambda i: (i, 0)),
        compiler_params=pltpu.CompilerParams(dimension_semantics=("parallel",)),
    )(seed_arr, x2d)
    return out.reshape(shape)


# ----------------------------------------------------------------------------
# Kernel 3: JPEGSimulator — 8x8 block DCT, quantize/round, dequantize, IDCT,
# expressed as block-diagonal matmuls on lane-dense (H, W) image tiles:
#   coeff = (I ⊗ D) @ X @ (I ⊗ Dᵀ);   rec = (I ⊗ Dᵀ) @ deq @ (I ⊗ D)
# TODO(synk): original JPEGSimulator source unavailable; this is a standard
# per-channel luminance-table (Q=50) round-trip, no chroma subsampling.
# ----------------------------------------------------------------------------
def _jpeg_kernel(x_ref, bl_ref, blt_ref, br_ref, brt_ref, q_ref, iq_ref, o_ref):
    X = x_ref[0].astype(jnp.float32) * 255.0 - 128.0           # (H, W) levels
    # Forward blockwise 2D DCT as two plain 2-D matmuls (MXU-shaped for real W)
    t = jnp.dot(bl_ref[...], X, preferred_element_type=jnp.float32)
    coeff = jnp.dot(t, br_ref[...], preferred_element_type=jnp.float32)
    # Quantize / dequantize (multiply by precomputed 1/Q; round-half-to-even)
    deq = jnp.round(coeff * iq_ref[...]) * q_ref[...]
    # Inverse blockwise 2D DCT
    t2 = jnp.dot(blt_ref[...], deq, preferred_element_type=jnp.float32)
    rec = jnp.dot(t2, brt_ref[...], preferred_element_type=jnp.float32)
    out = jnp.clip((rec + 128.0) * (1.0 / 255.0), 0.0, 1.0)
    o_ref[0] = out.astype(o_ref.dtype)


def jpeg_simulate(x):
    N, C, H, W = x.shape
    assert H % 8 == 0 and W % 8 == 0, "JPEG simulator needs H, W multiples of 8"
    nc = N * C
    x3 = x.reshape(nc, H, W)
    nb_h, nb_w = H // 8, W // 8
    # Block-diagonal DCT operators and tiled quant tables (host-side constants).
    bl = np.kron(np.eye(nb_h, dtype=np.float32), _DCT)          # (H, H)
    br = np.kron(np.eye(nb_w, dtype=np.float32), _DCT.T)        # (W, W)
    qf = np.tile(_QTABLE, (nb_h, nb_w)).astype(np.float32)      # (H, W)
    iqf = (1.0 / qf).astype(np.float32)

    const_specs = [
        pl.BlockSpec((H, H), lambda i: (0, 0)),   # BL   (resident: const index)
        pl.BlockSpec((H, H), lambda i: (0, 0)),   # BL^T
        pl.BlockSpec((W, W), lambda i: (0, 0)),   # BR
        pl.BlockSpec((W, W), lambda i: (0, 0)),   # BR^T
        pl.BlockSpec((H, W), lambda i: (0, 0)),   # Q
        pl.BlockSpec((H, W), lambda i: (0, 0)),   # 1/Q
    ]
    out = pl.pallas_call(
        _jpeg_kernel,
        out_shape=jax.ShapeDtypeStruct((nc, H, W), x.dtype),
        grid=(nc,),
        in_specs=[pl.BlockSpec((1, H, W), lambda i: (i, 0, 0))] + const_specs,
        out_specs=pl.BlockSpec((1, H, W), lambda i: (i, 0, 0)),
        compiler_params=pltpu.CompilerParams(dimension_semantics=("parallel",)),
    )(x3, jnp.asarray(bl), jnp.asarray(bl.T), jnp.asarray(br),
      jnp.asarray(br.T), jnp.asarray(qf), jnp.asarray(iqf))
    return out.reshape(N, C, H, W)


# ----------------------------------------------------------------------------
# NoiseLayer.forward — jittable, no host syncs (lax.switch branch selection).
# ----------------------------------------------------------------------------
def noise_layer_forward(x, key):
    """Equivalent of NoiseLayer.forward: pick one of the 3 noise ops at random."""
    if not NOISE_ENABLED:
        return x
    kb, ks = jax.random.split(key)
    r = jax.random.randint(kb, (), 0, 3)                         # torch.randint(0,3,[1])
    seed = jax.random.randint(ks, (1,), 0, jnp.iinfo(jnp.int32).max,
                              dtype=jnp.int32)
    return jax.lax.switch(
        r,
        [lambda v: gaussian_blur(v),          # self.GaussianBlur
         lambda v: gaussian_noise(v, seed),   # self.GaussianNoise
         lambda v: jpeg_simulate(v)],         # self.jpeg
        x,
    )


# ----------------------------------------------------------------------------
if __name__ == "__main__":
    key = jax.random.PRNGKey(0)
    kx, kr = jax.random.split(key)
    # Small NCHW input consistent with a conv-style image module.
    x = jax.random.uniform(kx, (2, 4, 16, 16), dtype=jnp.float32)

    # Exercise every branch's kernel once (sanity), then the actual forward.
    y_blur = jax.block_until_ready(gaussian_blur(x))
    y_gn = jax.block_until_ready(gaussian_noise(x, jnp.array([1234], jnp.int32)))
    y_jpeg = jax.block_until_ready(jpeg_simulate(x))
    for y in (y_blur, y_gn, y_jpeg):
        assert y.shape == x.shape and y.dtype == x.dtype
        assert bool(jnp.all(jnp.isfinite(y)))

    fwd = jax.jit(noise_layer_forward)
    out = jax.block_until_ready(fwd(x, kr))
    assert out.shape == x.shape and out.dtype == x.dtype
    assert bool(jnp.all(jnp.isfinite(out)))

    print("KERNEL_OK")
</pallas_src>

<mosaic_0001>
module attributes {stable_mosaic.version = 11 : i64} {
  func.func @_blur_kernel(%arg0: i32, %arg1: memref<8x18x18xf32, #tpu.memory_space<vmem>>, %arg2: memref<8x16x16xf32, #tpu.memory_space<vmem>>) attributes {dimension_semantics = [#tpu.dimension_semantics<parallel>], iteration_bounds = array<i64: 1>, scalar_prefetch = 0 : i64, scratch_operands = 0 : i64, tpu.core_type = #tpu.core_type<tc>, window_params = [{transform_indices = @transform_0, window_bounds = array<i64: 8, 18, 18>}, {transform_indices = @transform_1, window_bounds = array<i64: 8, 16, 16>}]} {
    %c0 = arith.constant 0 : index
    %c0_0 = arith.constant 0 : index
    %c0_1 = arith.constant 0 : index
    %0 = vector.load %arg1[%c0, %c0_0, %c0_1] : memref<8x18x18xf32, #tpu.memory_space<vmem>>, vector<8x18x18xf32>
    %cst = arith.constant 0.000000e+00 : f32
    %1 = vector.broadcast %cst : f32 to vector<8x16x16xf32>
    %2 = vector.extract_strided_slice %0 {offsets = [0, 0, 0], sizes = [8, 16, 16], strides = [1, 1, 1]} : vector<8x18x18xf32> to vector<8x16x16xf32>
    %cst_2 = arith.constant 0.0751136094 : f32
    %3 = vector.broadcast %cst_2 : f32 to vector<8x16x16xf32>
    %4 = arith.mulf %3, %2 : vector<8x16x16xf32>
    %5 = arith.addf %1, %4 : vector<8x16x16xf32>
    %6 = vector.extract_strided_slice %0 {offsets = [0, 0, 1], sizes = [8, 16, 16], strides = [1, 1, 1]} : vector<8x18x18xf32> to vector<8x16x16xf32>
    %cst_3 = arith.constant 0.123841405 : f32
    %7 = vector.broadcast %cst_3 : f32 to vector<8x16x16xf32>
    %8 = arith.mulf %7, %6 : vector<8x16x16xf32>
    %9 = arith.addf %5, %8 : vector<8x16x16xf32>
    %10 = vector.extract_strided_slice %0 {offsets = [0, 0, 2], sizes = [8, 16, 16], strides = [1, 1, 1]} : vector<8x18x18xf32> to vector<8x16x16xf32>
    %cst_4 = arith.constant 0.0751136094 : f32
    %11 = vector.broadcast %cst_4 : f32 to vector<8x16x16xf32>
    %12 = arith.mulf %11, %10 : vector<8x16x16xf32>
    %13 = arith.addf %9, %12 : vector<8x16x16xf32>
    %14 = vector.extract_strided_slice %0 {offsets = [0, 1, 0], sizes = [8, 16, 16], strides = [1, 1, 1]} : vector<8x18x18xf32> to vector<8x16x16xf32>
    %cst_5 = arith.constant 0.123841405 : f32
    %15 = vector.broadcast %cst_5 : f32 to vector<8x16x16xf32>
    %16 = arith.mulf %15, %14 : vector<8x16x16xf32>
    %17 = arith.addf %13, %16 : vector<8x16x16xf32>
    %18 = vector.extract_strided_slice %0 {offsets = [0, 1, 1], sizes = [8, 16, 16], strides = [1, 1, 1]} : vector<8x18x18xf32> to vector<8x16x16xf32>
    %cst_6 = arith.constant 0.204179958 : f32
    %19 = vector.broadcast %cst_6 : f32 to vector<8x16x16xf32>
    %20 = arith.mulf %19, %18 : vector<8x16x16xf32>
    %21 = arith.addf %17, %20 : vector<8x16x16xf32>
    %22 = vector.extract_strided_slice %0 {offsets = [0, 1, 2], sizes = [8, 16, 16], strides = [1, 1, 1]} : vector<8x18x18xf32> to vector<8x16x16xf32>
    %cst_7 = arith.constant 0.123841405 : f32
    %23 = vector.broadcast %cst_7 : f32 to vector<8x16x16xf32>
    %24 = arith.mulf %23, %22 : vector<8x16x16xf32>
    %25 = arith.addf %21, %24 : vector<8x16x16xf32>
    %26 = vector.extract_strided_slice %0 {offsets = [0, 2, 0], sizes = [8, 16, 16], strides = [1, 1, 1]} : vector<8x18x18xf32> to vector<8x16x16xf32>
    %cst_8 = arith.constant 0.0751136094 : f32
    %27 = vector.broadcast %cst_8 : f32 to vector<8x16x16xf32>
    %28 = arith.mulf %27, %26 : vector<8x16x16xf32>
    %29 = arith.addf %25, %28 : vector<8x16x16xf32>
    %30 = vector.extract_strided_slice %0 {offsets = [0, 2, 1], sizes = [8, 16, 16], strides = [1, 1, 1]} : vector<8x18x18xf32> to vector<8x16x16xf32>
    %cst_9 = arith.constant 0.123841405 : f32
    %31 = vector.broadcast %cst_9 : f32 to vector<8x16x16xf32>
    %32 = arith.mulf %31, %30 : vector<8x16x16xf32>
    %33 = arith.addf %29, %32 : vector<8x16x16xf32>
    %34 = vector.extract_strided_slice %0 {offsets = [0, 2, 2], sizes = [8, 16, 16], strides = [1, 1, 1]} : vector<8x18x18xf32> to vector<8x16x16xf32>
    %cst_10 = arith.constant 0.0751136094 : f32
    %35 = vector.broadcast %cst_10 : f32 to vector<8x16x16xf32>
    %36 = arith.mulf %35, %34 : vector<8x16x16xf32>
    %37 = arith.addf %33, %36 : vector<8x16x16xf32>
    %c0_11 = arith.constant 0 : index
    %c0_12 = arith.constant 0 : index
    %c0_13 = arith.constant 0 : index
    %38 = vector.load %arg2[%c0_11, %c0_12, %c0_13] : memref<8x16x16xf32, #tpu.memory_space<vmem>>, vector<8x16x16xf32>
    tpu.vector_store %arg2[%c0_11, %c0_12, %c0_13], %37 {strides = array<i32>} : memref<8x16x16xf32, #tpu.memory_space<vmem>>, vector<8x16x16xf32>,
    return
  }
  func.func @transform_0(%arg0: i32) -> (i32, i32, i32) {
    %c0_i32 = arith.constant 0 : i32
    %c0_i32_0 = arith.constant 0 : i32
    %c0_i32_1 = arith.constant 0 : i32
    return %arg0, %c0_i32, %c0_i32_0 : i32, i32, i32
  }
  func.func @transform_1(%arg0: i32) -> (i32, i32, i32) {
    %c0_i32 = arith.constant 0 : i32
    %c0_i32_0 = arith.constant 0 : i32
    %c0_i32_1 = arith.constant 0 : i32
    return %arg0, %c0_i32, %c0_i32_0 : i32, i32, i32
  }
}

</mosaic_0001>

<bundles_post_ra>
// kernel: tpu_custom_call.1
= control target key start
LH: loop header
LB: loop body
LE: loop exit
PB: predicated region body
PF: predicated region fallthrough
CT: control target
= control target key end

     0   :  { %s863_s14 = smov 127   ;;  %vm257_vm0 = vcmask 1046528   ;;  %s1735_s0 = inlined_call_operand.vmem [shape: f32[8,18,18], index: 0, kind: input, shape index: {}]   ;;  %s1736_s1 = inlined_call_operand.hbm [shape: f32[8,16,16], index: 1, kind: output, shape index: {}]  }
   0x1   :  { %v881_v0 = vld [vmem:[%s1735_s0 + $0x18] sm:$0xff]  ;;  %v886_v1 = vld [vmem:[%s1735_s0] sm:$0xff]  ;;  %v902_v5 = vld [vmem:[%s1735_s0 + $0x8] sm:$0xff] }
   0x2   :  { %v891_v2 = vld [vmem:[%s1735_s0 + $0x20] sm:$0xff]  ;;  %v894_v3 = vmul.f32 0.123841405, %v881_v0  ;;  %v897_v4 = vmul.f32 0.123841405, %v886_v1  ;;  %v917_v8 = vld [vmem:[%s1735_s0 + $0x38] sm:$0xff] }
   0x3   :  { %v909_v6 = vmul.f32 0.123841405, %v891_v2  ;;  %v912_v7 = vmul.f32 0.123841405, %v902_v5  ;;  %v922_v9 = vld [vmem:[%s1735_s0 + $0x30] sm:$0xff]  ;;  %v944_v15 = vld [vmem:[%s1735_s0 + $0x48] sm:$0xff] }
   0x4   :  { %101 = vrot.lane.b32.xlu1 %v894_v3, %s863_s14  ;;  %97 = vrot.lane.b32.xlu0 %v897_v4, %s863_s14  ;;  %v258_v10 = vrot.slane %v897_v4, 1  ;;  %v931_v12 = vmul.f32 0.123841405, %v917_v8  ;;  %v934_v13 = vmul.f32 0.123841405, %v922_v9  ;;  %v939_v14 = vld [vmem:[%s1735_s0 + $0x50] sm:$0xff] }
   0x5   :  { %v1752_v11 = vrot.slane %v912_v7, 1  ;;  %v1751_v17 = vrot.slane %v909_v6, 1  ;;  %v263_v18 = vrot.slane %v894_v3, 1  ;;  %v958_v19 = vmul.f32 0.123841405, %v939_v14  ;;  %v966_v21 = vld [vmem:[%s1735_s0 + $0x68] sm:$0xff] }
   0x6   :  { %v961_v20 = vmul.f32 0.123841405, %v944_v15  ;;  %v971_v22 = vld [vmem:[%s1735_s0 + $0x60] sm:$0xff]  ;;  %v983_v24 = vmul.f32 0.123841405, %v966_v21  ;;  %v996_v27 = vld [vmem:[%s1735_s0 + $0x78] sm:$0xff] }
   0x7   :  { %v949_v16 = vsel %vm257_vm0, %v258_v10, %v1752_v11  ;;  %v976_v23 = vsel %vm257_vm0, %v263_v18, %v1751_v17  ;;  %v986_v25 = vmul.f32 0.123841405, %v971_v22  ;;  %v991_v26 = vld [vmem:[%s1735_s0 + $0x80] sm:$0xff]  ;;  %v1006_v29 = vmul.f32 0.123841405, %v996_v27  ;;  %v1011_v30 = vld [vmem:[%s1735_s0 + $0x98] sm:$0xff] }
   0x8   :  { %103 = vrot.lane.b32.xlu1 %v909_v6, %s863_s14  ;;  %99 = vrot.lane.b32.xlu0 %v912_v7, %s863_s14  ;;  %v1003_v28 = vmul.f32 0.123841405, %v991_v26  ;;  %v1016_v31 = vld [vmem:[%s1735_s0 + $0x90] sm:$0xff]  ;;  %v1023_v32 = vmul.f32 0.123841405, %v1011_v30  ;;  %v1036_v35 = vld [vmem:[%s1735_s0 + $0xa8] sm:$0xff] }
   0x9   :  { %v1026_v33 = vmul.f32 0.123841405, %v1016_v31  ;;  %v1031_v34 = vld [vmem:[%s1735_s0 + $0xb0] sm:$0xff]  ;;  %v1046_v37 = vmul.f32 0.123841405, %v1036_v35 }
   0xa   :  { %v1043_v36 = vmul.f32 0.123841405, %v1031_v34 }
   0xc   :  { %107 = vrot.lane.b32.xlu1 %v931_v12, %s863_s14  ;;  %105 = vrot.lane.b32.xlu0 %v934_v13, %s863_s14 }
  0x10   :  { %111 = vrot.lane.b32.xlu1 %v958_v19, %s863_s14  ;;  %109 = vrot.lane.b32.xlu0 %v961_v20, %s863_s14 }
  0x14   :  { %115 = vrot.lane.b32.xlu1 %v983_v24, %s863_s14  ;;  %113 = vrot.lane.b32.xlu0 %v986_v25, %s863_s14 }
  0x18   :  { %119 = vrot.lane.b32.xlu1 %v1003_v28, %s863_s14  ;;  %117 = vrot.lane.b32.xlu0 %v1006_v29, %s863_s14 }
  0x1c   :  { %123 = vrot.lane.b32.xlu1 %v1023_v32, %s863_s14  ;;  %121 = vrot.lane.b32.xlu0 %v1026_v33, %s863_s14 }
  0x1d   :  { %6 = vsyncpa [#allocation3], 0  ;;  %v1053_v38 = vmul.f32 0.07511361, %v902_v5  ;;  %v1056_v39 = vmul.f32 0.07511361, %v886_v1 }
  0x1e   :  { %v1750_v40 = vrot.slane %v931_v12, 1  ;;  %v268_v41 = vrot.slane %v934_v13, 1  ;;  %v1749_v42 = vrot.slane %v958_v19, 1  ;;  %s864_s10 = smov 126   ;;  %v1066_v43 = vmul.f32 0.07511361, %v891_v2 }
  0x1f   :  { %v1069_v44 = vmul.f32 0.07511361, %v881_v0  ;;  %v273_v46 = vrot.slane %v961_v20, 1  ;;  %v1742_v47 = vrot.slane %v983_v24, 1  ;;  %v278_v48 = vrot.slane %v986_v25, 1 }
  0x20   :  { %127 = vrot.lane.b32.xlu1 %v1043_v36, %s863_s14  ;;  %125 = vrot.lane.b32.xlu0 %v1046_v37, %s863_s14  ;;  %v1074_v45 = vsel %vm257_vm0, %v268_v41, %v1750_v40  ;;  %v1741_v50 = vrot.slane %v1003_v28, 1  ;;  %v283_v52 = vrot.slane %v1006_v29, 1  ;;  %v1096_v53 = vmul.f32 0.07511361, %v917_v8 }
  0x21   :  { %v1082_v49 = vsel %vm257_vm0, %v273_v46, %v1749_v42  ;;  %v1088_v51 = vsel %vm257_vm0, %v278_v48, %v1742_v47  ;;  %v1099_v54 = vmul.f32 0.07511361, %v922_v9  ;;  %v1738_v55 = vrot.slane %v1023_v32, 1 }
  0x22   :  { %v288_v56 = vrot.slane %v1026_v33, 1  ;;  %v1106_v57 = vsel %vm257_vm0, %v283_v52, %v1741_v50  ;;  %v1737_v58 = vrot.slane %v1043_v36, 1  ;;  %v293_v60 = vrot.slane %v1046_v37, 1 }
  0x23   :  { %1775 = vst [vmem:[#allocation5_spill] sm:$0xff] %v1106_v57  ;;  %vm562_vm1 = vcmask 1045504   ;;  %v1740_v61 = vrot.slane %v912_v7, 2  ;;  %v635_v62 = vrot.slane %v897_v4, 2  ;;  %v1122_v63 = vmul.f32 0.07511361, %v939_v14 }
  0x24   :  { %179 = vrot.lane.b32.xlu1 %v1053_v38, %s864_s10  ;;  %177 = vrot.lane.b32.xlu0 %v1056_v39, %s864_s10  ;;  %v1112_v59 = vsel %vm257_vm0, %v288_v56, %v1738_v55  ;;  %v1125_v10 = vmul.f32 0.07511361, %v944_v15  ;;  %v1130_v18 = vsel %vm257_vm0, %v293_v60, %v1737_v58  ;;  %v1739_v41 = vrot.slane %v909_v6, 2 }
  0x25   :  { %1776 = vst [vmem:[#allocation6_spill] sm:$0xff] %v1112_v59  ;;  %1777 = vst [vmem:[#allocation7_spill] sm:$0xff] %v1130_v18  ;;  %v1136_v4 = vsel %vm562_vm1, %v635_v62, %v1740_v61  ;;  %v640_v46 = vrot.slane %v894_v3, 2  ;;  %v1745_v48 = vrot.slane %v931_v12, 2  ;;  %v645_v52 = vrot.slane %v934_v13, 2 }
  0x26   :  { %v1744_v56 = vrot.slane %v958_v19, 2  ;;  %v650_v58 = vrot.slane %v961_v20, 2  ;;  %v1743_v55 = vrot.slane %v983_v24, 2  ;;  %v1154_v3 = vmul.f32 0.07511361, %v966_v21 }
  0x27   :  { %v1145_v60 = vsel %vm562_vm1, %v640_v46, %v1739_v41  ;;  %v1157_v13 = vmul.f32 0.07511361, %v971_v22  ;;  %v1162_v62 = vsel %vm562_vm1, %v645_v52, %v1745_v48  ;;  %v655_v20 = vrot.slane %v986_v25, 2 }
  0x28   :  { %183 = vrot.lane.b32.xlu1 %v1066_v43, %s864_s10  ;;  %181 = vrot.lane.b32.xlu0 %v1069_v44, %s864_s10  ;;  %v1168_v46 = vsel %vm562_vm1, %v650_v58, %v1744_v56  ;;  %v1747_v41 = vrot.slane %v1003_v28, 2  ;;  %v660_v50 = vrot.slane %v1006_v29, 2  ;;  %v1746_v47 = vrot.slane %v1023_v32, 2  ;;  %v1204_v56 = vld [vmem:[%s1735_s0 + $0x10] sm:$0x3] }
  0x29   :  { %1778 = vst [vmem:[#allocation8_spill] sm:$0xff] %v1157_v13  ;;  %v1174_v61 = vsel %vm562_vm1, %v655_v20, %v1743_v55  ;;  %v665_v52 = vrot.slane %v1026_v33, 2  ;;  %v1748_v25 = vrot.slane %v1043_v36, 2  ;;  %v1185_v58 = vmul.f32 0.07511361, %v991_v26 }
  0x2a   :  { %v1188_v20 = vmul.f32 0.07511361, %v996_v27  ;;  %v1193_v29 = vsel %vm562_vm1, %v660_v50, %v1747_v41  ;;  %v670_v33 = vrot.slane %v1046_v37, 2  ;;  %v1216_v37 = vmul.f32 0.07511361, %v1011_v30 }
  0x2b   :  { %1779 = vst [vmem:[#allocation9_spill] sm:$0xff] %v1185_v58  ;;  %v1199_v55 = vsel %vm562_vm1, %v665_v52, %v1746_v47  ;;  %v1219_v50 = vmul.f32 0.07511361, %v1016_v31  ;;  %v331_v52 = vmul.f32 0.20417996, %v902_v5  ;;  %vm803_vm2 = vcmask 130048  }
  0x2c   :  { %187 = vrot.lane.b32.xlu1 %v1096_v53, %s864_s10  ;;  %185 = vrot.lane.b32.xlu0 %v1099_v54, %s864_s10  ;;  %1780 = vst [vmem:[#allocation10_spill] sm:$0xff] %v1188_v20  ;;  %v1209_v48 = vsel %vm562_vm1, %v670_v33, %v1748_v25  ;;  %1781 = vst [vmem:[#allocation11_spill] sm:$0xff] %v1216_v37  ;;  %v332_v47 = vmul.f32 0.20417996, %v1204_v56  ;;  %v330_v41 = vmul.f32 0.20417996, %v886_v1 }
  0x2d   :  { %1782 = vst [vmem:[#allocation12_spill] sm:$0xff] %v1219_v50  ;;  %v1227_v33 = vld [vmem:[%s1735_s0 + $0x28] sm:$0x3]  ;;  %v1230_v25 = vmul.f32 0.07511361, %v1031_v34  ;;  %v379_v17 = vrot.slane %v331_v52, 1 }
  0x2e   :  { %v1233_v42 = vmul.f32 0.07511361, %v1036_v35  ;;  %v334_v5 = vmul.f32 0.20417996, %v891_v2  ;;  %v335_v1 = vmul.f32 0.20417996, %v1227_v33 }
  0x2f   :  { %1783 = vst [vmem:[#allocation13_spill] sm:$0xff] %v1230_v25  ;;  %v333_v40 = vmul.f32 0.20417996, %v881_v0  ;;  %v381_v11 = vrot.slane %v332_v47, 1  ;;  %v336_v52 = vmul.f32 0.20417996, %v922_v9 }
  0x30   :  { %191 = vrot.lane.b32.xlu1 %v1122_v63, %s864_s10  ;;  %189 = vrot.lane.b32.xlu0 %v1125_v10, %s864_s10  ;;  %1784 = vst [vmem:[#allocation14_spill] sm:$0xff] %v1233_v42  ;;  %v386_v2 = vrot.slane %v335_v1, 1 }
  0x31   :  { %v382_v0 = vsel %vm257_vm0, %v379_v17, %v381_v11  ;;  %v388_v1 = vrot.slane %v336_v52, 1 }
  0x34   :  { %195 = vrot.lane.b32.xlu1 %v1154_v3, %s864_s10  ;;  %193 = vrot.lane.b32.xlu0 %v1157_v13, %s864_s10  ;;  %v337_v13 = vmul.f32 0.20417996, %v917_v8  ;;  %v340_v8 = vmul.f32 0.20417996, %v939_v14 }
  0x36   :  { %v389_v9 = vrot.slane %v337_v13, 1 }
  0x38   :  { %199 = vrot.lane.b32.xlu1 %v1185_v58, %s864_s10  ;;  %197 = vrot.lane.b32.xlu0 %v1188_v20, %s864_s10  ;;  %v378_v20 = vrot.slane %v330_v41, 1  ;;  %v1245_v58 = vld [vmem:[%s1735_s0 + $0x40] sm:$0x3]  ;;  %v390_v13 = vsel %vm257_vm0, %v388_v1, %v389_v9 }
  0x39   :  { %v338_v41 = vmul.f32 0.20417996, %v1245_v58 }
  0x3a   :  { %v380_v47 = vsel %vm257_vm0, %v378_v20, %v379_v17  ;;  %v339_v17 = vmul.f32 0.20417996, %v944_v15 }
  0x3c   :  { %203 = vrot.lane.b32.xlu1 %v1216_v37, %s864_s10  ;;  %201 = vrot.lane.b32.xlu0 %v1219_v50, %s864_s10  ;;  %v384_v50 = vrot.slane %v334_v5, 1  ;;  %v383_v37 = vrot.slane %v333_v40, 1  ;;  %v391_v5 = vrot.slane %v338_v41, 1  ;;  %v1283_v41 = vld [vmem:[%s1735_s0 + $0x88] sm:$0x3] }
  0x3d   :  { %1785 = vst [vmem:[#allocation15_spill] sm:$0xff] %v1283_v41 }
  0x3e   :  { %v385_v40 = vsel %vm257_vm0, %v383_v37, %v384_v50  ;;  %v387_v20 = vsel %vm257_vm0, %v384_v50, %v386_v2  ;;  %v394_v37 = vrot.slane %v340_v8, 1  ;;  %v392_v15 = vsel %vm257_vm0, %v389_v9, %v391_v5  ;;  %v1295_v9 = vld [vmem:[%s1735_s0 + $0xa0] sm:$0x3] }
  0x3f   :  { %v342_v2 = vmul.f32 0.20417996, %v971_v22  ;;  %v347_v8 = vmul.f32 0.20417996, %v1283_v41  ;;  %1786 = vst [vmem:[#allocation16_spill] sm:$0xff] %v1295_v9 }
  0x40   :  { %207 = vrot.lane.b32.xlu1 %v1230_v25, %s864_s10  ;;  %205 = vrot.lane.b32.xlu0 %v1233_v42, %s864_s10  ;;  %v1259_v25 = vld [vmem:[%s1735_s0 + $0x58] sm:$0x3]  ;;  %v1271_v42 = vld [vmem:[%s1735_s0 + $0x70] sm:$0x3] }
  0x41   :  { %v341_v11 = vmul.f32 0.20417996, %v1259_v25  ;;  %v344_v50 = vmul.f32 0.20417996, %v1271_v42  ;;  %v398_v22 = vrot.slane %v342_v2, 1  ;;  %v406_v1 = vrot.slane %v347_v8, 1 }
  0x42   :  { %v352_v2 = vmul.f32 0.20417996, %v1031_v34 }
  0x43   :  { %v396_v14 = vrot.slane %v341_v11, 1 }
  0x44   :  { %420 = vrot.lane.b32.xlu1 %v382_v0, %s863_s14  ;;  %418 = vrot.lane.b32.xlu0 %v380_v47, %s863_s14  ;;  %v393_v0 = vrot.slane %v339_v17, 1  ;;  %v343_v47 = vmul.f32 0.20417996, %v966_v21  ;;  %v401_v17 = vrot.slane %v344_v50, 1  ;;  %v414_v8 = vrot.slane %v352_v2, 1 }
  0x45   :  { %v397_v52 = vsel %vm257_vm0, %v394_v37, %v396_v14  ;;  %v350_v14 = vmul.f32 0.20417996, %v1295_v9  ;;  %v1790_v2 = vrot.slane %v931_v12, 1 }
  0x46   :  { %v399_v21 = vrot.slane %v343_v47, 1  ;;  %v395_v11 = vsel %vm257_vm0, %v393_v0, %v394_v37  ;;  %v348_v47 = vmul.f32 0.20417996, %v1016_v31 }
  0x47   :  { %v411_v50 = vrot.slane %v350_v14, 1  ;;  %v1788_v14 = vrot.slane %v912_v7, 1 }
  0x48   :  { %424 = vrot.lane.b32.xlu1 %v387_v20, %s863_s14  ;;  %422 = vrot.lane.b32.xlu0 %v385_v40, %s863_s14  ;;  %v346_v40 = vmul.f32 0.20417996, %v991_v26  ;;  %v345_v20 = vmul.f32 0.20417996, %v996_v27  ;;  %v349_v26 = vmul.f32 0.20417996, %v1011_v30  ;;  %v402_v37 = vsel %vm257_vm0, %v399_v21, %v401_v17 }
  0x49   :  { %v400_v0 = vsel %vm257_vm0, %v398_v22, %v399_v21  ;;  %v408_v21 = vrot.slane %v348_v47, 1  ;;  %v1789_v47 = vrot.slane %v909_v6, 1 }
  0x4a   :  { %v404_v5 = vrot.slane %v346_v40, 1  ;;  %v403_v27 = vrot.slane %v345_v20, 1  ;;  %v351_v40 = vmul.f32 0.20417996, %v1036_v35 }
  0x4c   :  { %428 = vrot.lane.b32.xlu1 %v392_v15, %s863_s14  ;;  %426 = vrot.lane.b32.xlu0 %v390_v13, %s863_s14  ;;  %v1307_v15 = vld [vmem:[%s1735_s0 + $0xb8] sm:$0x3]  ;;  %v407_v30 = vsel %vm257_vm0, %v404_v5, %v406_v1  ;;  %v409_v13 = vrot.slane %v349_v26, 1  ;;  %v413_v34 = vrot.slane %v351_v40, 1  ;;  %v242_v26 = vmul.f32 0.123841405, %v1227_v33 }
  0x4d   :  { %1787 = vst [vmem:[#allocation17_spill] sm:$0xff] %v1307_v15  ;;  %v353_v31 = vmul.f32 0.20417996, %v1307_v15  ;;  %v1791_v40 = vrot.slane %v958_v19, 1  ;;  %s865_s0 = smov [#allocation2]  }
  0x4e   :  { %v412_v17 = vsel %vm257_vm0, %v409_v13, %v411_v50  ;;  %v410_v22 = vsel %vm257_vm0, %v408_v21, %v409_v13  ;;  %v415_v35 = vsel %vm257_vm0, %v413_v34, %v414_v8  ;;  %v244_v50 = vmul.f32 0.123841405, %v1259_v25 }
  0x4f   :  { %v416_v20 = vrot.slane %v353_v31, 1  ;;  %v245_v31 = vmul.f32 0.123841405, %v1271_v42 }
  0x50   :  { %432 = vrot.lane.b32.xlu1 %v397_v52, %s863_s14  ;;  %430 = vrot.lane.b32.xlu0 %v395_v11, %s863_s14  ;;  %v405_v52 = vsel %vm257_vm0, %v403_v27, %v404_v5  ;;  %v241_v11 = vmul.f32 0.123841405, %v1204_v56  ;;  %v243_v27 = vmul.f32 0.123841405, %v1245_v58  ;;  %v276_v21 = vrot.slane %v244_v50, 1 }
  0x51   :  { %v417_v5 = vsel %vm257_vm0, %v414_v8, %v416_v20  ;;  %v1792_v20 = vrot.slane %v983_v24, 1 }
  0x52   :  { %v261_v1 = vrot.slane %v241_v11, 1  ;;  %v271_v13 = vrot.slane %v243_v27, 1  ;;  %v1361_v8 = vsel %vm257_vm0, %v1791_v40, %v276_v21  ;;  %v1795_v21 = vrot.slane %v1023_v32, 1 }
  0x54   :  { %436 = vrot.lane.b32.xlu1 %v402_v37, %s863_s14  ;;  %434 = vrot.lane.b32.xlu0 %v400_v0, %s863_s14  ;;  %v1331_v37 = vsel %vm257_vm0, %v1788_v14, %v261_v1  ;;  %v266_v0 = vrot.slane %v242_v26, 1  ;;  %v1793_v1 = vrot.slane %v1003_v28, 1 }
  0x58   :  { %440 = vrot.lane.b32.xlu1 %v407_v30, %s863_s14  ;;  %438 = vrot.lane.b32.xlu0 %v405_v52, %s863_s14  ;;  %v1341_v30 = vsel %vm257_vm0, %v1789_v47, %v266_v0  ;;  %v1351_v52 = vsel %vm257_vm0, %v1790_v2, %v271_v13  ;;  %v1387_v47 = vmul.f32 0.123841405, %v1307_v15 }
  0x5c   :  { %444 = vrot.lane.b32.xlu1 %v412_v17, %s863_s14  ;;  %442 = vrot.lane.b32.xlu0 %v410_v22, %s863_s14  ;;  %v281_v17 = vrot.slane %v245_v31, 1  ;;  %v246_v22 = vmul.f32 0.123841405, %v1283_v41 }
  0x5e   :  { %v1371_v34 = vsel %vm257_vm0, %v1792_v20, %v281_v17  ;;  %v296_v17 = vrot.slane %v1387_v47, 1 }
  0x60   :  { %448 = vrot.lane.b32.xlu1 %v417_v5, %s863_s14  ;;  %446 = vrot.lane.b32.xlu0 %v415_v35, %s863_s14  ;;  %v286_v5 = vrot.slane %v246_v22, 1  ;;  %v1374_v35 = vmul.f32 0.123841405, %v1295_v9  ;;  %v638_v9 = vrot.slane %v241_v11, 2  ;;  %v1799_v11 = vrot.slane %v909_v6, 2 }
  0x62   :  { %v1383_v14 = vsel %vm257_vm0, %v1793_v1, %v286_v5  ;;  %v291_v0 = vrot.slane %v1374_v35, 1  ;;  %v1797_v1 = vrot.slane %v1043_v36, 1 }
  0x63   :  { %1794 = vst [vmem:[#allocation18_spill] sm:$0xff] %v1383_v14 }
  0x64   :  { %484 = vrot.lane.b32.xlu1 %v1331_v37, %s864_s10  ;;  %482 = vrot.lane.b32.xlu0 %v949_v16, %s864_s10  ;;  %v1396_v40 = vsel %vm257_vm0, %v1795_v21, %v291_v0  ;;  %v1406_v15 = vsel %vm257_vm0, %v1797_v1, %v296_v17  ;;  %v1798_v0 = vrot.slane %v912_v7, 2  ;;  %v648_v1 = vrot.slane %v243_v27, 2 }
  0x65   :  { %1796 = vst [vmem:[#allocation19_spill] sm:$0xff] %v1396_v40  ;;  %v1801_v27 = vrot.slane %v958_v19, 2 }
  0x66   :  { %v639_v21 = vsel %vm562_vm1, %v1798_v0, %v638_v9  ;;  %v1800_v9 = vrot.slane %v931_v12, 2  ;;  %v653_v0 = vrot.slane %v244_v50, 2  ;;  %v1802_v50 = vrot.slane %v983_v24, 2 }
  0x67   :  { %v1803_v24 = vrot.slane %v1003_v28, 2 }
  0x68   :  { %488 = vrot.lane.b32.xlu1 %v1341_v30, %s864_s10  ;;  %486 = vrot.lane.b32.xlu0 %v976_v23, %s864_s10 }
  0x6c   :  { %492 = vrot.lane.b32.xlu1 %v1351_v52, %s864_s10  ;;  %490 = vrot.lane.b32.xlu0 %v1074_v45, %s864_s10 }
  0x70   :  { %496 = vrot.lane.b32.xlu1 %v1361_v8, %s864_s10  ;;  %494 = vrot.lane.b32.xlu0 %v1082_v49, %s864_s10 }
  0x74   :  { %500 = vrot.lane.b32.xlu1 %v1371_v34, %s864_s10  ;;  %498 = vrot.lane.b32.xlu0 %v1088_v51, %s864_s10 }
  0x76   :  { %v102_v13 = vpop.permute.xlu1 %101  ;;  %v98_v2 = vpop.permute.xlu0 %97 }
  0x77   :  { %v147_v28 = vadd.f32 %v102_v13, %v1069_v44 }
  0x78   :  { %504 = vrot.lane.b32.xlu1 %v1383_v14, %s864_s10  ;;  %502 = vrot.lane.b32.xlu0 %v1106_v57, %s864_s10 }
  0x7a   :  { %v104_v20 = vpop.permute.xlu1 %103  ;;  %v100_v5 = vpop.permute.xlu0 %99 }
  0x7c   :  { %508 = vrot.lane.b32.xlu1 %v1396_v40, %s864_s10  ;;  %506 = vrot.lane.b32.xlu0 %v1112_v59, %s864_s10  ;;  %v643_v40 = vrot.slane %v242_v26, 2  ;;  %v649_v26 = vsel %vm562_vm1, %v1800_v9, %v648_v1  ;;  %v145_v1 = vadd.f32 %v98_v2, %v1056_v39  ;;  %v673_v2 = vrot.slane %v1387_v47, 2 }
  0x7d   :  { %v563_v47 = vrot.slane %v1056_v39, 2 }
  0x7e   :  { %v108_v57 = vpop.permute.xlu1 %107  ;;  %v106_v14 = vpop.permute.xlu0 %105  ;;  %v644_v17 = vsel %vm562_vm1, %v1799_v11, %v643_v40  ;;  %v654_v40 = vsel %vm562_vm1, %v1801_v27, %v653_v0 }
  0x80   :  { %512 = vrot.lane.b32.xlu1 %v1406_v15, %s864_s10  ;;  %510 = vrot.lane.b32.xlu0 %v1130_v18, %s864_s10 }
  0x82   :  { %v1415_v59 = vpop.permute.xlu1 %111  ;;  %v1417_v41 = vpop.permute.xlu0 %109 }
  0x84   :  { %677 = vrot.lane.b32.xlu1 %v639_v21, %s863_s14  ;;  %675 = vrot.lane.b32.xlu0 %v1136_v4, %s863_s14  ;;  %v658_v21 = vrot.slane %v245_v31, 2  ;;  %v668_v31 = vrot.slane %v1374_v35, 2 }
  0x86   :  { %v1425_v18 = vpop.permute.xlu1 %115  ;;  %v1427_v7 = vpop.permute.xlu0 %113  ;;  %v659_v11 = vsel %vm562_vm1, %v1802_v50, %v658_v21 }
  0x88   :  { %681 = vrot.lane.b32.xlu1 %v644_v17, %s863_s14  ;;  %679 = vrot.lane.b32.xlu0 %v1145_v60, %s863_s14  ;;  %v663_v17 = vrot.slane %v246_v22, 2 }
  0x8a   :  { %v1435_v4 = vpop.permute.xlu1 %119  ;;  %v1437_v6 = vpop.permute.xlu0 %117  ;;  %v664_v9 = vsel %vm562_vm1, %v1803_v24, %v663_v17 }
  0x8c   :  { %685 = vrot.lane.b32.xlu1 %v649_v26, %s863_s14  ;;  %683 = vrot.lane.b32.xlu0 %v1162_v62, %s863_s14 }
  0x8e   :  { %v1445_v60 = vpop.permute.xlu1 %123  ;;  %v1447_v12 = vpop.permute.xlu0 %121 }
  0x90   :  { %689 = vrot.lane.b32.xlu1 %v654_v40, %s863_s14  ;;  %687 = vrot.lane.b32.xlu0 %v1168_v46, %s863_s14  ;;  %v146_v46 = vadd.f32 %v100_v5, %v1053_v38  ;;  %v546_v5 = vmul.f32 0.07511361, %v1204_v56  ;;  %v148_v40 = vadd.f32 %v104_v20, %v1066_v43  ;;  %v1805_v56 = vrot.slane %v1043_v36, 2 }
  0x91   :  { %v150_v20 = vadd.f32 %v108_v57, %v1096_v53 }
  0x92   :  { %v1455_v62 = vpop.permute.xlu1 %127  ;;  %v1457_v19 = vpop.permute.xlu0 %125  ;;  %v566_v13 = vrot.slane %v546_v5, 2 }
  0x94   :  { %693 = vrot.lane.b32.xlu1 %v659_v11, %s863_s14  ;;  %691 = vrot.lane.b32.xlu0 %v1174_v61, %s863_s14  ;;  %v1804_v61 = vrot.slane %v1023_v32, 2 }
  0x96   :  { %v180_v22 = vpop.permute.xlu1 %179  ;;  %v178_v26 = vpop.permute.xlu0 %177  ;;  %v669_v35 = vsel %vm562_vm1, %v1804_v61, %v668_v31  ;;  %v564_v31 = vrot.slane %v1053_v38, 2 }
  0x97   :  { %v226_v0 = vadd.f32 %v180_v22, %v146_v46  ;;  %v225_v27 = vadd.f32 %v178_v26, %v145_v1  ;;  %v149_v1 = vadd.f32 %v106_v14, %v1099_v54  ;;  %v569_v22 = vrot.slane %v1066_v43, 2 }
  0x98   :  { %697 = vrot.lane.b32.xlu1 %v664_v9, %s863_s14  ;;  %695 = vrot.lane.b32.xlu0 %v1193_v29, %s863_s14  ;;  %v1502_v36 = vsel %vm562_vm1, %v563_v47, %v564_v31  ;;  %v1509_v57 = vsel %vm562_vm1, %v564_v31, %v566_v13  ;;  %v152_v14 = vadd.f32 %v1415_v59, %v1122_v63  ;;  %v1807_v31 = vld [vmem:[#allocation9_spill] sm:$0xff] }
  0x99   :  { %v1479_v21 = vadd.f32 %v1331_v37, %v226_v0  ;;  %v1482_v50 = vadd.f32 %v949_v16, %v225_v27  ;;  %v674_v37 = vsel %vm562_vm1, %v1805_v56, %v673_v2  ;;  %v547_v16 = vmul.f32 0.07511361, %v1227_v33  ;;  %v1806_v2 = vld [vmem:[#allocation8_spill] sm:$0xff]  ;;  %v1808_v56 = vld [vmem:[#allocation10_spill] sm:$0xff] }
  0x9a   :  { %v184_v11 = vpop.permute.xlu1 %183  ;;  %v182_v29 = vpop.permute.xlu0 %181  ;;  %v151_v26 = vadd.f32 %v1417_v41, %v1125_v10  ;;  %v156_v47 = vadd.f32 %v1435_v4, %v1807_v31 }
  0x9b   :  { %v228_v17 = vadd.f32 %v184_v11, %v148_v40  ;;  %v227_v32 = vadd.f32 %v182_v29, %v147_v28  ;;  %v571_v33 = vrot.slane %v547_v16, 2 }
  0x9c   :  { %701 = vrot.lane.b32.xlu1 %v669_v35, %s863_s14  ;;  %699 = vrot.lane.b32.xlu0 %v1199_v55, %s863_s14 }
  0x9d   :  { %v1496_v38 = vadd.f32 %v1341_v30, %v228_v17  ;;  %v1499_v39 = vadd.f32 %v976_v23, %v227_v32  ;;  %v568_v23 = vrot.slane %v1069_v44, 2  ;;  %v548_v30 = vmul.f32 0.07511361, %v1245_v58 }
  0x9e   :  { %v188_v46 = vpop.permute.xlu1 %187  ;;  %v186_v24 = vpop.permute.xlu0 %185  ;;  %v574_v44 = vrot.slane %v1096_v53, 2  ;;  %v573_v58 = vrot.slane %v1099_v54, 2  ;;  %v1530_v59 = vsel %vm562_vm1, %v569_v22, %v571_v33  ;;  %v154_v53 = vadd.f32 %v1425_v18, %v1154_v3  ;;  %v1812_v33 = vld [vmem:[#allocation18_spill] sm:$0xff] }
  0x9f   :  { %v230_v55 = vadd.f32 %v188_v46, %v150_v20  ;;  %v229_v9 = vadd.f32 %v186_v24, %v149_v1  ;;  %v576_v41 = vrot.slane %v548_v30, 2  ;;  %v153_v54 = vadd.f32 %v1427_v7, %v1806_v2  ;;  %v1813_v30 = vld [vmem:[#allocation5_spill] sm:$0xff] }
  0xa0   :  { %705 = vrot.lane.b32.xlu1 %v674_v37, %s863_s14  ;;  %703 = vrot.lane.b32.xlu0 %v1209_v48, %s863_s14  ;;  %v1547_v32 = vsel %vm562_vm1, %v573_v58, %v574_v44  ;;  %v550_v7 = vmul.f32 0.07511361, %v1271_v42  ;;  %v583_v42 = vrot.slane %v1806_v2, 2  ;;  %v588_v58 = vrot.slane %v1808_v56, 2  ;;  %s825_s14 = sshll.u32 %s865_s0, 4  ;;  %s826_s14 = int_to_ptr.vmem [resolvable:$true] %s825_s14 }
  0xa1   :  { %v1518_v43 = vadd.f32 %v1351_v52, %v230_v55  ;;  %v1521_v0 = vadd.f32 %v1074_v45, %v229_v9  ;;  %v1533_v45 = vsel %vm562_vm1, %v568_v23, %v569_v22  ;;  %v549_v52 = vmul.f32 0.07511361, %v1259_v25  ;;  %v1810_v55 = vld [vmem:[#allocation11_spill] sm:$0xff]  ;;  %v1811_v9 = vld [vmem:[#allocation12_spill] sm:$0xff]  ;;  %s841_s28 = scalar_lea.vmem %s826_s14, 2048  ;;  %p846_p1 = scmp.lt.s32.totalorder %s826_s14, %s826_s14 }
  0xa2   :  { %v192_v48 = vpop.permute.xlu1 %191  ;;  %v190_v27 = vpop.permute.xlu0 %189  ;;  %v579_v25 = vrot.slane %v1122_v63, 2  ;;  %v1555_v18 = vsel %vm562_vm1, %v574_v44, %v576_v41  ;;  %v155_v63 = vadd.f32 %v1437_v6, %v1808_v56  ;;  %v586_v4 = vrot.slane %v550_v7, 2  ;;  %v1809_v6 = vld [vmem:[#allocation15_spill] sm:$0xff]  ;;  %v1814_v41 = vld [vmem:[#allocation16_spill] sm:$0xff]  ;;  %p842_p0 = scmp.ne.s32.totalorder %s826_s14, %s841_s28  ;;  %p847_p2 = scmp.lt.s32.totalorder %s841_s28, %s841_s28 }
  0xa3   :  { %v232_v61 = vadd.f32 %v192_v48, %v152_v14  ;;  %v231_v35 = vadd.f32 %v190_v27, %v151_v26  ;;  %v551_v24 = vmul.f32 0.07511361, %v1809_v6  ;;  %v157_v22 = vadd.f32 %v1447_v12, %v1811_v9 }
  0xa4   :  { %741 = vrot.lane.b32.xlu1 %v1509_v57, %s864_s10  ;;  %739 = vrot.lane.b32.xlu0 %v1502_v36, %s864_s10  ;;  %v589_v44 = vrot.slane %v1807_v31, 2  ;;  %v593_v56 = vrot.slane %v1811_v9, 2  ;;  %p848_p3 = por %p847_p2, %p846_p1 }
  0xa5   :  { %v1541_v5 = vadd.f32 %v1361_v8, %v232_v61  ;;  %v1544_v28 = vadd.f32 %v1082_v49, %v231_v35  ;;  %v581_v49 = vrot.slane %v549_v52, 2  ;;  %v578_v8 = vrot.slane %v1125_v10, 2 }
  0xa6   :  { %v196_v40 = vpop.permute.xlu1 %195  ;;  %v194_v11 = vpop.permute.xlu0 %193  ;;  %v584_v10 = vrot.slane %v1154_v3, 2  ;;  %v158_v3 = vadd.f32 %v1445_v60, %v1810_v55  ;;  %v591_v12 = vrot.slane %v551_v24, 2  ;;  %v552_v52 = vmul.f32 0.07511361, %v1814_v41  ;;  %p849_p4 = pnand %p848_p3, %p842_p0 }
  0xa7   :  { %v234_v29 = vadd.f32 %v196_v40, %v154_v53  ;;  %v233_v17 = vadd.f32 %v194_v11, %v153_v54  ;;  %v1815_v53 = vld [vmem:[#allocation13_spill] sm:$0xff]  ;;  %v1816_v54 = vld [vmem:[#allocation14_spill] sm:$0xff]  ;;  %v1817_v11 = vld [vmem:[#allocation19_spill] sm:$0xff] }
  0xa8   :  { %745 = vrot.lane.b32.xlu1 %v1530_v59, %s864_s10  ;;  %743 = vrot.lane.b32.xlu0 %v1533_v45, %s864_s10  ;;  %v1593_v35 = vsel %vm562_vm1, %v583_v42, %v584_v10  ;;  %v1601_v60 = vsel %vm562_vm1, %v584_v10, %v586_v4  ;;  %v160_v2 = vadd.f32 %v1455_v62, %v1815_v53  ;;  %v594_v62 = vrot.slane %v1810_v55, 2 }
  0xa9   :  { %v1564_v37 = vadd.f32 %v1371_v34, %v234_v29  ;;  %v1567_v13 = vadd.f32 %v1088_v51, %v233_v17  ;;  %v1576_v34 = vsel %vm562_vm1, %v579_v25, %v581_v49  ;;  %v1579_v51 = vsel %vm562_vm1, %v578_v8, %v579_v25  ;;  %v1818_v17 = vld [vmem:[#allocation6_spill] sm:$0xff] }
  0xaa   :  { %v200_v16 = vpop.permute.xlu1 %199  ;;  %v198_v20 = vpop.permute.xlu0 %197  ;;  %v159_v40 = vadd.f32 %v1457_v19, %v1816_v54  ;;  %v596_v19 = vrot.slane %v552_v52, 2  ;;  %v599_v55 = vrot.slane %v1815_v53, 2 }
  0xab   :  { %v236_v1 = vadd.f32 %v200_v16, %v156_v47  ;;  %v235_v46 = vadd.f32 %v198_v20, %v155_v63  ;;  %v1616_v47 = vsel %vm562_vm1, %v588_v58, %v589_v44  ;;  %v1621_v63 = vsel %vm562_vm1, %v589_v44, %v591_v12  ;;  %v1819_v16 = vld [vmem:[#allocation17_spill] sm:$0xff] }
  0xac   :  { %749 = vrot.lane.b32.xlu1 %v1555_v18, %s864_s10  ;;  %747 = vrot.lane.b32.xlu0 %v1547_v32, %s864_s10  ;;  %v553_v20 = vmul.f32 0.07511361, %v1819_v16 }
  0xad   :  { %v1587_v23 = vadd.f32 %v1812_v33, %v236_v1  ;;  %v1590_v14 = vadd.f32 %v1813_v30, %v235_v46  ;;  %v1820_v46 = vld [vmem:[#allocation7_spill] sm:$0xff] }
  0xae   :  { %v204_v26 = vpop.permute.xlu1 %203  ;;  %v202_v48 = vpop.permute.xlu0 %201  ;;  %v601_v9 = vrot.slane %v553_v20, 2 }
  0xaf   :  { %v238_v27 = vadd.f32 %v204_v26, %v158_v3  ;;  %v237_v61 = vadd.f32 %v202_v48, %v157_v22  ;;  %v1634_v3 = vsel %vm562_vm1, %v594_v62, %v596_v19  ;;  %v598_v22 = vrot.slane %v1816_v54, 2 }
  0xb0   :  { %753 = vrot.lane.b32.xlu1 %v1576_v34, %s864_s10  ;;  %751 = vrot.lane.b32.xlu0 %v1579_v51, %s864_s10  ;;  %v1647_v26 = vsel %vm562_vm1, %v599_v55, %v601_v9 }
  0xb1   :  { %v327_v29 = vadd.f32 %v1817_v11, %v238_v27  ;;  %v326_v25 = vadd.f32 %v1818_v17, %v237_v61  ;;  %v1650_v48 = vsel %vm562_vm1, %v598_v22, %v599_v55 }
  0xb2   :  { %v208_v49 = vpop.permute.xlu1 %207  ;;  %v206_v8 = vpop.permute.xlu0 %205 }
  0xb3   :  { %v240_v7 = vadd.f32 %v208_v49, %v160_v2  ;;  %v239_v31 = vadd.f32 %v206_v8, %v159_v40 }
  0xb4   :  { %757 = vrot.lane.b32.xlu1 %v1601_v60, %s864_s10  ;;  %755 = vrot.lane.b32.xlu0 %v1593_v35, %s864_s10 }
  0xb5   :  { %v329_v1 = vadd.f32 %v1406_v15, %v240_v7  ;;  %v328_v10 = vadd.f32 %v1820_v46, %v239_v31  ;;  %v1637_v15 = vsel %vm562_vm1, %v593_v56, %v594_v62 }
  0xb6   :  { %v421_v42 = vpop.permute.xlu1 %420  ;;  %v419_v4 = vpop.permute.xlu0 %418 }
  0xb7   :  { %v467_v6 = vadd.f32 %v421_v42, %v1479_v21  ;;  %v466_v24 = vadd.f32 %v419_v4, %v1482_v50 }
  0xb8   :  { %761 = vrot.lane.b32.xlu1 %v1621_v63, %s864_s10  ;;  %759 = vrot.lane.b32.xlu0 %v1616_v47, %s864_s10 }
  0xba   :  { %v425_v21 = vpop.permute.xlu1 %424  ;;  %v423_v33 = vpop.permute.xlu0 %422 }
  0xbb   :  { %v469_v50 = vadd.f32 %v425_v21, %v1496_v38  ;;  %v468_v30 = vadd.f32 %v423_v33, %v1499_v39 }
  0xbc   :  { %765 = vrot.lane.b32.xlu1 %v1634_v3, %s864_s10  ;;  %763 = vrot.lane.b32.xlu0 %v1637_v15, %s864_s10 }
  0xbe   :  { %v429_v27 = vpop.permute.xlu1 %428  ;;  %v427_v61 = vpop.permute.xlu0 %426 }
  0xbf   :  { %v471_v44 = vadd.f32 %v429_v27, %v1518_v43  ;;  %v470_v38 = vadd.f32 %v427_v61, %v1521_v0 }
  0xc0   :  { %769 = vrot.lane.b32.xlu1 %v1647_v26, %s864_s10  ;;  %767 = vrot.lane.b32.xlu0 %v1650_v48, %s864_s10 }
  0xc2   :  { %v433_v39 = vpop.permute.xlu1 %432  ;;  %v431_v12 = vpop.permute.xlu0 %430 }
  0xc3   :  { %v473_v58 = vadd.f32 %v433_v39, %v1541_v5  ;;  %v472_v41 = vadd.f32 %v431_v12, %v1544_v28 }
  0xc6   :  { %v437_v52 = vpop.permute.xlu1 %436  ;;  %v435_v53 = vpop.permute.xlu0 %434 }
  0xc7   :  { %v475_v2 = vadd.f32 %v437_v52, %v1564_v37  ;;  %v474_v43 = vadd.f32 %v435_v53, %v1567_v13 }
  0xca   :  { %v441_v54 = vpop.permute.xlu1 %440  ;;  %v439_v0 = vpop.permute.xlu0 %438 }
  0xcb   :  { %v477_v40 = vadd.f32 %v441_v54, %v1587_v23  ;;  %v476_v11 = vadd.f32 %v439_v0, %v1590_v14 }
  0xce   :  { %v445_v17 = vpop.permute.xlu1 %444  ;;  %v443_v49 = vpop.permute.xlu0 %442 }
  0xcf   :  { %v479_v8 = vadd.f32 %v445_v17, %v327_v29  ;;  %v478_v7 = vadd.f32 %v443_v49, %v326_v25 }
  0xd2   :  { %v449_v31 = vpop.permute.xlu1 %448  ;;  %v447_v5 = vpop.permute.xlu0 %446 }
  0xd3   :  { %v481_v62 = vadd.f32 %v449_v31, %v329_v1  ;;  %v480_v28 = vadd.f32 %v447_v5, %v328_v10 }
  0xd6   :  { %v485_v19 = vpop.permute.xlu1 %484  ;;  %v483_v56 = vpop.permute.xlu0 %482 }
  0xd7   :  { %v531_v16 = vadd.f32 %v485_v19, %v467_v6  ;;  %v530_v37 = vadd.f32 %v483_v56, %v466_v24 }
  0xd9   :  { %v620_v13 = vadd.f32 %v1509_v57, %v531_v16  ;;  %v619_v20 = vadd.f32 %v1502_v36, %v530_v37 }
  0xda   :  { %v489_v46 = vpop.permute.xlu1 %488  ;;  %v487_v23 = vpop.permute.xlu0 %486 }
  0xdb   :  { %v533_v42 = vadd.f32 %v489_v46, %v469_v50  ;;  %v532_v14 = vadd.f32 %v487_v23, %v468_v30 }
  0xdd   :  { %v622_v4 = vadd.f32 %v1530_v59, %v533_v42  ;;  %v621_v29 = vadd.f32 %v1533_v45, %v532_v14 }
  0xde   :  { %v493_v25 = vpop.permute.xlu1 %492  ;;  %v491_v55 = vpop.permute.xlu0 %490 }
  0xdf   :  { %v535_v1 = vadd.f32 %v493_v25, %v471_v44  ;;  %v534_v10 = vadd.f32 %v491_v55, %v470_v38 }
  0xe1   :  { %v1669_v9 = vadd.f32 %v1555_v18, %v535_v1  ;;  %v1672_v6 = vadd.f32 %v1547_v32, %v534_v10 }
  0xe2   :  { %v497_v57 = vpop.permute.xlu1 %496  ;;  %v495_v36 = vpop.permute.xlu0 %494 }
  0xe3   :  { %v537_v24 = vadd.f32 %v497_v57, %v473_v58  ;;  %v536_v22 = vadd.f32 %v495_v36, %v472_v41 }
  0xe5   :  { %v1675_v21 = vadd.f32 %v1576_v34, %v537_v24  ;;  %v1678_v59 = vadd.f32 %v1579_v51, %v536_v22 }
  0xe6   :  { %v501_v45 = vpop.permute.xlu1 %500  ;;  %v499_v33 = vpop.permute.xlu0 %498 }
  0xe7   :  { %v539_v50 = vadd.f32 %v501_v45, %v475_v2  ;;  %v538_v30 = vadd.f32 %v499_v33, %v474_v43 }
  0xe9   :  { %v1681_v18 = vadd.f32 %v1601_v60, %v539_v50  ;;  %v1684_v32 = vadd.f32 %v1593_v35, %v538_v30 }
  0xea   :  { %v505_v27 = vpop.permute.xlu1 %504  ;;  %v503_v61 = vpop.permute.xlu0 %502 }
  0xeb   :  { %v541_v44 = vadd.f32 %v505_v27, %v477_v40  ;;  %v540_v38 = vadd.f32 %v503_v61, %v476_v11 }
  0xed   :  { %v1687_v34 = vadd.f32 %v1621_v63, %v541_v44  ;;  %v1690_v51 = vadd.f32 %v1616_v47, %v540_v38 }
  0xee   :  { %v509_v39 = vpop.permute.xlu1 %508  ;;  %v507_v12 = vpop.permute.xlu0 %506 }
  0xef   :  { %v543_v58 = vadd.f32 %v509_v39, %v479_v8  ;;  %v542_v41 = vadd.f32 %v507_v12, %v478_v7 }
  0xf1   :  { %v1693_v60 = vadd.f32 %v1634_v3, %v543_v58  ;;  %v1696_v35 = vadd.f32 %v1637_v15, %v542_v41 }
  0xf2   :  { %v513_v52 = vpop.permute.xlu1 %512  ;;  %v511_v53 = vpop.permute.xlu0 %510 }
  0xf3   :  { %v545_v2 = vadd.f32 %v513_v52, %v481_v62  ;;  %v544_v43 = vadd.f32 %v511_v53, %v480_v28 }
  0xf5   :  { %v1699_v63 = vadd.f32 %v1647_v26, %v545_v2  ;;  %v1702_v47 = vadd.f32 %v1650_v48, %v544_v43 }
  0xf6   :  { %v678_v54 = vpop.permute.xlu1 %677  ;;  %v676_v0 = vpop.permute.xlu0 %675 }
  0xf7   :  { %v724_v56 = vadd.f32 %v678_v54, %v620_v13  ;;  %v723_v16 = vadd.f32 %v676_v0, %v619_v20 }
  0xfa   :  { %v682_v40 = vpop.permute.xlu1 %681  ;;  %v680_v11 = vpop.permute.xlu0 %679 }
  0xfb   :  { %v726_v42 = vadd.f32 %v682_v40, %v622_v4  ;;  %v725_v14 = vadd.f32 %v680_v11, %v621_v29 }
  0xfe   :  { %v686_v17 = vpop.permute.xlu1 %685  ;;  %v684_v3 = vpop.permute.xlu0 %683 }
  0xff   :  { %v728_v57 = vadd.f32 %v686_v17, %v1669_v9  ;;  %v727_v13 = vadd.f32 %v684_v3, %v1672_v6 }
 0x102   :  { %v690_v49 = vpop.permute.xlu1 %689  ;;  %v688_v8 = vpop.permute.xlu0 %687 }
 0x103   :  { %v730_v24 = vadd.f32 %v690_v49, %v1675_v21  ;;  %v729_v22 = vadd.f32 %v688_v8, %v1678_v59 }
 0x106   :  { %v694_v15 = vpop.permute.xlu1 %693  ;;  %v692_v7 = vpop.permute.xlu0 %691 }
 0x107   :  { %v732_v50 = vadd.f32 %v694_v15, %v1681_v18  ;;  %v731_v30 = vadd.f32 %v692_v7, %v1684_v32 }
 0x10a   :  { %v698_v31 = vpop.permute.xlu1 %697  ;;  %v696_v5 = vpop.permute.xlu0 %695 }
 0x10b   :  { %v734_v44 = vadd.f32 %v698_v31, %v1687_v34  ;;  %v733_v38 = vadd.f32 %v696_v5, %v1690_v51 }
 0x10e   :  { %v702_v62 = vpop.permute.xlu1 %701  ;;  %v700_v28 = vpop.permute.xlu0 %699 }
 0x10f   :  { %v736_v58 = vadd.f32 %v702_v62, %v1693_v60  ;;  %v735_v41 = vadd.f32 %v700_v28, %v1696_v35 }
 0x112   :  { %v706_v19 = vpop.permute.xlu1 %705  ;;  %v704_v26 = vpop.permute.xlu0 %703 }
 0x113   :  { %v738_v2 = vadd.f32 %v706_v19, %v1699_v63  ;;  %v737_v43 = vadd.f32 %v704_v26, %v1702_v47 }
 0x116   :  { %v742_v48 = vpop.permute.xlu1 %741  ;;  %v740_v37 = vpop.permute.xlu0 %739 }
 0x117   :  { %v788_v46 = vadd.f32 %v742_v48, %v724_v56  ;;  %v787_v23 = vadd.f32 %v740_v37, %v723_v16 }
 0x119   :  { %805 = vst.msk [vmem:[#allocation2 + $0x8] sm:$0xff] %vm803_vm2, %v788_v46  ;;  %804 = vst.msk [vmem:[#allocation2] sm:$0xff] %vm803_vm2, %v787_v23 }
 0x11a   :  { %v746_v25 = vpop.permute.xlu1 %745  ;;  %v744_v55 = vpop.permute.xlu0 %743 }
 0x11b   :  { %v790_v1 = vadd.f32 %v746_v25, %v726_v42  ;;  %v789_v10 = vadd.f32 %v744_v55, %v725_v14 }
 0x11d   :  { %807 = vst.msk [vmem:[#allocation2 + $0x18] sm:$0xff] %vm803_vm2, %v790_v1  ;;  %806 = vst.msk [vmem:[#allocation2 + $0x10] sm:$0xff] %vm803_vm2, %v789_v10 }
 0x11e   :  { %v750_v20 = vpop.permute.xlu1 %749  ;;  %v748_v36 = vpop.permute.xlu0 %747 }
 0x11f   :  { %v792_v4 = vadd.f32 %v750_v20, %v728_v57  ;;  %v791_v29 = vadd.f32 %v748_v36, %v727_v13 }
 0x121   :  { %809 = vst.msk [vmem:[#allocation2 + $0x28] sm:$0xff] %vm803_vm2, %v792_v4  ;;  %808 = vst.msk [vmem:[#allocation2 + $0x20] sm:$0xff] %vm803_vm2, %v791_v29 }
 0x122   :  { %v754_v45 = vpop.permute.xlu1 %753  ;;  %v752_v9 = vpop.permute.xlu0 %751 }
 0x123   :  { %v794_v33 = vadd.f32 %v754_v45, %v730_v24  ;;  %v793_v6 = vadd.f32 %v752_v9, %v729_v22 }
 0x125   :  { %811 = vst.msk [vmem:[#allocation2 + $0x38] sm:$0xff] %vm803_vm2, %v794_v33  ;;  %810 = vst.msk [vmem:[#allocation2 + $0x30] sm:$0xff] %vm803_vm2, %v793_v6 }
 0x126   :  { %v758_v27 = vpop.permute.xlu1 %757  ;;  %v756_v21 = vpop.permute.xlu0 %755 }
 0x127   :  { %v796_v61 = vadd.f32 %v758_v27, %v732_v50  ;;  %v795_v59 = vadd.f32 %v756_v21, %v731_v30 }
 0x129   :  { %813 = vst.msk [vmem:[#allocation2 + $0x48] sm:$0xff] %vm803_vm2, %v796_v61  ;;  %812 = vst.msk [vmem:[#allocation2 + $0x40] sm:$0xff] %vm803_vm2, %v795_v59 }
 0x12a   :  { %v762_v39 = vpop.permute.xlu1 %761  ;;  %v760_v18 = vpop.permute.xlu0 %759 }
 0x12b   :  { %v798_v12 = vadd.f32 %v762_v39, %v734_v44  ;;  %v797_v32 = vadd.f32 %v760_v18, %v733_v38 }
 0x12d   :  { %815 = vst.msk [vmem:[#allocation2 + $0x58] sm:$0xff] %vm803_vm2, %v798_v12  ;;  %814 = vst.msk [vmem:[#allocation2 + $0x50] sm:$0xff] %vm803_vm2, %v797_v32 }
 0x12e   :  { %v766_v52 = vpop.permute.xlu1 %765  ;;  %v764_v34 = vpop.permute.xlu0 %763 }
 0x12f   :  { %v800_v53 = vadd.f32 %v766_v52, %v736_v58  ;;  %v799_v51 = vadd.f32 %v764_v34, %v735_v41 }
 0x131   :  { %817 = vst.msk [vmem:[#allocation2 + $0x68] sm:$0xff] %vm803_vm2, %v800_v53  ;;  %816 = vst.msk [vmem:[#allocation2 + $0x60] sm:$0xff] %vm803_vm2, %v799_v51 }
 0x132   :  { %v770_v60 = vpop.permute.xlu1 %769  ;;  %v768_v35 = vpop.permute.xlu0 %767 }
 0x133   :  { %v802_v54 = vadd.f32 %v770_v60, %v738_v2  ;;  %v801_v0 = vadd.f32 %v768_v35, %v737_v43 }
 0x135   :  { %819 = vst.msk [vmem:[#allocation2 + $0x78] sm:$0xff] %vm803_vm2, %v802_v54  ;;  %818 = vst.msk [vmem:[#allocation2 + $0x70] sm:$0xff] %vm803_vm2, %v801_v0 }
 0x136   :  { %852 = shalt.err (!%p849_p4)
}
 0x137   :  { %s866_s29 = smov 128   ;;  %s867_s30 = smov 8  }
 0x138   :  { %831 = dma.vmem_to_hbm [thread:$0]  %s826_s14, 2048, %s1736_s1, [#allocation3], %s866_s29, %s866_s29, %s867_s30  }
 0x139   :  { %861 = dma.done.wait [#allocation3], 2048  }
 0x13a   :  { %862 = vsyncadd [#allocation3], 4294965248 }
 0x13b   :  { %835 = vsyncpa [#allocation3], 1 }

</bundles_post_ra>
